<compile_context>
chip_gen: v6e
topology: v6e:2x2x1
jax: 0.10.0
libtpu: 0.0.40
codegen_flags: <defaults>
</compile_context>

<pallas_src>
import jax
import jax.numpy as jnp
from jax.experimental import pallas as pl
from jax.experimental.pallas import tpu as pltpu

SUBLANE = 8
MAX_BATCH_TILE = 2048  # large tiles amortize the ~0.35us per-grid-step cost


def critic_kernel(s_ref, a_ref, w1s_ref, w1a_ref, b1_ref,
                  w2_ref, b2_ref, w3_ref, b3_ref, o_ref):
    # layer 1: fused concat -> state @ W1[:Ds] + action @ W1[Ds:] + b1, ReLU
    h = jnp.dot(s_ref[...], w1s_ref[...], preferred_element_type=jnp.float32)
    h = h + jnp.dot(a_ref[...], w1a_ref[...], preferred_element_type=jnp.float32)
    h = jnp.maximum(h + b1_ref[...], 0.0)
    # layer 2: hidden -> hidden, ReLU
    h = jnp.dot(h, w2_ref[...], preferred_element_type=jnp.float32)
    h = jnp.maximum(h + b2_ref[...], 0.0)
    # output layer: narrow (tb, out_size) store; masked vst is noise vs. HBM bytes
    q = jnp.dot(h, w3_ref[...], preferred_element_type=jnp.float32) + b3_ref[...]
    o_ref[...] = q.astype(o_ref.dtype)


def _round_up(x, m):
    return ((x + m - 1) // m) * m


def _choose_batch_tile(B):
    tb = min(MAX_BATCH_TILE, _round_up(B, SUBLANE))
    # Ensure >=2 grid steps whenever B > 8 so the "parallel" batch axis can be
    # sharded across v7x's two TensorCores (no-op on single-TC v5e/v6e).
    if B > SUBLANE:
        tb = min(tb, _round_up(pl.cdiv(B, 2), SUBLANE))
    return tb


def prepare_critic_params(params, state_dim):
    """One-time param prep (outside the forward path): split W1 row-wise so the
    concat can be fused in-kernel as state@W1[:Ds] + action@W1[Ds:]."""
    w1, b1, w2, b2, w3, b3 = params
    return (w1[:state_dim], w1[state_dim:], b1, w2, b2, w3, b3)


def critic_forward(state, action, prepared_params):
    """state: [B, Ds], action: [B, Da]; returns Q-values [B, output_size]."""
    w1_s, w1_a, b1, w2, b2, w3, b3 = prepared_params
    B, Ds = state.shape
    Da = action.shape[1]
    H = w2.shape[0]
    out_size = w3.shape[1]

    tb = _choose_batch_tile(B)
    grid = (pl.cdiv(B, tb),)      # ragged last block handled by Pallas masking
    row = lambda i: (i, 0)        # activations / output: march over batch tiles
    const = lambda i: (0, 0)      # weights & biases: VMEM-resident across steps

    return pl.pallas_call(
        critic_kernel,
        out_shape=jax.ShapeDtypeStruct((B, out_size), jnp.float32),
        grid_spec=pltpu.PrefetchScalarGridSpec(
            num_scalar_prefetch=0,
            grid=grid,
            in_specs=[
                pl.BlockSpec((tb, Ds), row),        # state tile
                pl.BlockSpec((tb, Da), row),        # action tile
                pl.BlockSpec((Ds, H), const),       # W1 (state rows)
                pl.BlockSpec((Da, H), const),       # W1 (action rows)
                pl.BlockSpec((1, H), const),        # b1
                pl.BlockSpec((H, H), const),        # W2
                pl.BlockSpec((1, H), const),        # b2
                pl.BlockSpec((H, out_size), const), # W3 (unpadded)
                pl.BlockSpec((1, out_size), const), # b3 (unpadded)
            ],
            out_specs=pl.BlockSpec((tb, out_size), row),
        ),
        compiler_params=pltpu.CompilerParams(
            dimension_semantics=("parallel",),
            vmem_limit_bytes=32 * 1024 * 1024,
        ),
    )(state, action, w1_s, w1_a, b1, w2, b2, w3, b3)


def init_params(key, input_size, hidden_size, output_size):
    """Deterministic init matching nn.Linear defaults + the 0.003 output init."""
    k = jax.random.split(key, 6)

    def linear_init(kw, kb, fan_in, fan_out, scale=None):
        bound = scale if scale is not None else 1.0 / jnp.sqrt(float(fan_in))
        w = jax.random.uniform(kw, (fan_in, fan_out), jnp.float32, -bound, bound)
        b = jax.random.uniform(kb, (1, fan_out), jnp.float32, -bound, bound)
        return w, b

    w1, b1 = linear_init(k[0], k[1], input_size, hidden_size)
    w2, b2 = linear_init(k[2], k[3], hidden_size, hidden_size)
    w3, b3 = linear_init(k[4], k[5], hidden_size, output_size, scale=0.003)
    return (w1, b1, w2, b2, w3, b3)


def critic_ref(state, action, params):
    """Pure-JAX reference for verification."""
    w1, b1, w2, b2, w3, b3 = params
    x = jnp.concatenate([state, action], axis=1)
    x = jnp.maximum(x @ w1 + b1, 0.0)
    x = jnp.maximum(x @ w2 + b2, 0.0)
    return x @ w3 + b3


if __name__ == "__main__":
    # shapes consistent with the module: state_dim=12, action_dim=4
    # -> input_size=16, hidden_size=32, output_size=1, batch=2
    batch, state_dim, action_dim = 2, 12, 4
    input_size, hidden_size, output_size = state_dim + action_dim, 32, 1

    key = jax.random.PRNGKey(0)
    k_state, k_action, k_params = jax.random.split(key, 3)

    state = jax.random.normal(k_state, (batch, state_dim), jnp.float32)
    action = jax.random.normal(k_action, (batch, action_dim), jnp.float32)
    params = init_params(k_params, input_size, hidden_size, output_size)
    prepared = prepare_critic_params(params, state_dim)   # one-time prep

    q = critic_forward(state, action, prepared)
    jax.block_until_ready(q)

    q_ref = critic_ref(state, action, params)
    assert q.shape == (batch, output_size)
    assert jnp.allclose(q, q_ref, atol=1e-5, rtol=1e-5), "mismatch vs reference"

    # also exercise a non-tile-aligned, multi-step-grid batch (ragged last block)
    k2s, k2a = jax.random.split(jax.random.PRNGKey(1))
    big_b = 37
    state2 = jax.random.normal(k2s, (big_b, state_dim), jnp.float32)
    action2 = jax.random.normal(k2a, (big_b, action_dim), jnp.float32)
    q2 = critic_forward(state2, action2, prepared)
    jax.block_until_ready(q2)
    assert q2.shape == (big_b, output_size)
    assert jnp.allclose(q2, critic_ref(state2, action2, params), atol=1e-5, rtol=1e-5)

    print("KERNEL_OK")
</pallas_src>

<mosaic_0001>
module attributes {stable_mosaic.version = 11 : i64} {
  func.func @critic_kernel(%arg0: i32, %arg1: memref<8x12xf32, #tpu.memory_space<vmem>>, %arg2: memref<8x4xf32, #tpu.memory_space<vmem>>, %arg3: memref<12x32xf32, #tpu.memory_space<vmem>>, %arg4: memref<4x32xf32, #tpu.memory_space<vmem>>, %arg5: memref<1x32xf32, #tpu.memory_space<vmem>>, %arg6: memref<32x32xf32, #tpu.memory_space<vmem>>, %arg7: memref<1x32xf32, #tpu.memory_space<vmem>>, %arg8: memref<32x1xf32, #tpu.memory_space<vmem>>, %arg9: memref<1x1xf32, #tpu.memory_space<vmem>>, %arg10: memref<8x1xf32, #tpu.memory_space<vmem>>) attributes {dimension_semantics = [#tpu.dimension_semantics<parallel>], iteration_bounds = array<i64: 1>, scalar_prefetch = 0 : i64, scratch_operands = 0 : i64, tpu.core_type = #tpu.core_type<tc>, window_params = [{transform_indices = @transform_0, window_bounds = array<i64: 8, 12>}, {transform_indices = @transform_1, window_bounds = array<i64: 8, 4>}, {pipeline_mode = #tpu.pipeline_mode<synchronous>, transform_indices = @transform_2, window_bounds = array<i64: 12, 32>}, {pipeline_mode = #tpu.pipeline_mode<synchronous>, transform_indices = @transform_3, window_bounds = array<i64: 4, 32>}, {pipeline_mode = #tpu.pipeline_mode<synchronous>, transform_indices = @transform_4, window_bounds = array<i64: 1, 32>}, {pipeline_mode = #tpu.pipeline_mode<synchronous>, transform_indices = @transform_5, window_bounds = array<i64: 32, 32>}, {pipeline_mode = #tpu.pipeline_mode<synchronous>, transform_indices = @transform_6, window_bounds = array<i64: 1, 32>}, {pipeline_mode = #tpu.pipeline_mode<synchronous>, transform_indices = @transform_7, window_bounds = array<i64: 32, 1>}, {pipeline_mode = #tpu.pipeline_mode<synchronous>, transform_indices = @transform_8, window_bounds = array<i64: 1, 1>}, {transform_indices = @transform_9, window_bounds = array<i64: 8, 1>}]} {
    %c0 = arith.constant 0 : index
    %c0_0 = arith.constant 0 : index
    %0 = vector.load %arg1[%c0, %c0_0] : memref<8x12xf32, #tpu.memory_space<vmem>>, vector<8x12xf32>
    %c0_1 = arith.constant 0 : index
    %c0_2 = arith.constant 0 : index
    %1 = vector.load %arg3[%c0_1, %c0_2] : memref<12x32xf32, #tpu.memory_space<vmem>>, vector<12x32xf32>
    %cst = arith.constant dense<0.000000e+00> : vector<8x32xf32>
    %2 = tpu.matmul %0, %1, %cst {dimension_numbers = #tpu.dot_dimension_numbers<[1], [0], [0], [1], [0, 0, 1, 1], [], []>} : vector<8x12xf32>, vector<12x32xf32>, vector<8x32xf32> -> vector<8x32xf32>
    %c0_3 = arith.constant 0 : index
    %c0_4 = arith.constant 0 : index
    %3 = vector.load %arg2[%c0_3, %c0_4] : memref<8x4xf32, #tpu.memory_space<vmem>>, vector<8x4xf32>
    %c0_5 = arith.constant 0 : index
    %c0_6 = arith.constant 0 : index
    %4 = vector.load %arg4[%c0_5, %c0_6] : memref<4x32xf32, #tpu.memory_space<vmem>>, vector<4x32xf32>
    %cst_7 = arith.constant dense<0.000000e+00> : vector<8x32xf32>
    %5 = tpu.matmul %3, %4, %cst_7 {dimension_numbers = #tpu.dot_dimension_numbers<[1], [0], [0], [1], [0, 0, 1, 1], [], []>} : vector<8x4xf32>, vector<4x32xf32>, vector<8x32xf32> -> vector<8x32xf32>
    %6 = arith.addf %2, %5 : vector<8x32xf32>
    %c0_8 = arith.constant 0 : index
    %c0_9 = arith.constant 0 : index
    %7 = vector.load %arg5[%c0_8, %c0_9] : memref<1x32xf32, #tpu.memory_space<vmem>>, vector<1x32xf32>
    %8 = vector.broadcast %7 : vector<1x32xf32> to vector<8x32xf32>
    %9 = arith.addf %6, %8 : vector<8x32xf32>
    %cst_10 = arith.constant 0.000000e+00 : f32
    %10 = vector.broadcast %cst_10 : f32 to vector<8x32xf32>
    %11 = arith.maximumf %9, %10 : vector<8x32xf32>
    %c0_11 = arith.constant 0 : index
    %c0_12 = arith.constant 0 : index
    %12 = vector.load %arg6[%c0_11, %c0_12] : memref<32x32xf32, #tpu.memory_space<vmem>>, vector<32x32xf32>
    %cst_13 = arith.constant dense<0.000000e+00> : vector<8x32xf32>
    %13 = tpu.matmul %11, %12, %cst_13 {dimension_numbers = #tpu.dot_dimension_numbers<[1], [0], [0], [1], [0, 0, 1, 1], [], []>} : vector<8x32xf32>, vector<32x32xf32>, vector<8x32xf32> -> vector<8x32xf32>
    %c0_14 = arith.constant 0 : index
    %c0_15 = arith.constant 0 : index
    %14 = vector.load %arg7[%c0_14, %c0_15] : memref<1x32xf32, #tpu.memory_space<vmem>>, vector<1x32xf32>
    %15 = vector.broadcast %14 : vector<1x32xf32> to vector<8x32xf32>
    %16 = arith.addf %13, %15 : vector<8x32xf32>
    %cst_16 = arith.constant 0.000000e+00 : f32
    %17 = vector.broadcast %cst_16 : f32 to vector<8x32xf32>
    %18 = arith.maximumf %16, %17 : vector<8x32xf32>
    %c0_17 = arith.constant 0 : index
    %c0_18 = arith.constant 0 : index
    %19 = vector.load %arg8[%c0_17, %c0_18] : memref<32x1xf32, #tpu.memory_space<vmem>>, vector<32x1xf32>
    %cst_19 = arith.constant dense<0.000000e+00> : vector<8x1xf32>
    %20 = tpu.matmul %18, %19, %cst_19 {dimension_numbers = #tpu.dot_dimension_numbers<[1], [0], [0], [1], [0, 0, 1, 1], [], []>} : vector<8x32xf32>, vector<32x1xf32>, vector<8x1xf32> -> vector<8x1xf32>
    %c0_20 = arith.constant 0 : index
    %c0_21 = arith.constant 0 : index
    %21 = vector.load %arg9[%c0_20, %c0_21] : memref<1x1xf32, #tpu.memory_space<vmem>>, vector<1x1xf32>
    %22 = vector.broadcast %21 : vector<1x1xf32> to vector<8x1xf32>
    %23 = arith.addf %20, %22 : vector<8x1xf32>
    %c0_22 = arith.constant 0 : index
    %c0_23 = arith.constant 0 : index
    %24 = vector.load %arg10[%c0_22, %c0_23] : memref<8x1xf32, #tpu.memory_space<vmem>>, vector<8x1xf32>
    tpu.vector_store %arg10[%c0_22, %c0_23], %23 {strides = array<i32>} : memref<8x1xf32, #tpu.memory_space<vmem>>, vector<8x1xf32>,
    return
  }
  func.func @transform_0(%arg0: i32) -> (i32, i32) {
    %c0_i32 = arith.constant 0 : i32
    %c0_i32_0 = arith.constant 0 : i32
    return %arg0, %c0_i32 : i32, i32
  }
  func.func @transform_1(%arg0: i32) -> (i32, i32) {
    %c0_i32 = arith.constant 0 : i32
    %c0_i32_0 = arith.constant 0 : i32
    return %arg0, %c0_i32 : i32, i32
  }
  func.func @transform_2(%arg0: i32) -> (i32, i32) {
    %c0_i32 = arith.constant 0 : i32
    %c0_i32_0 = arith.constant 0 : i32
    %c0_i32_1 = arith.constant 0 : i32
    return %c0_i32, %c0_i32_0 : i32, i32
  }
  func.func @transform_3(%arg0: i32) -> (i32, i32) {
    %c0_i32 = arith.constant 0 : i32
    %c0_i32_0 = arith.constant 0 : i32
    %c0_i32_1 = arith.constant 0 : i32
    return %c0_i32, %c0_i32_0 : i32, i32
  }
  func.func @transform_4(%arg0: i32) -> (i32, i32) {
    %c0_i32 = arith.constant 0 : i32
    %c0_i32_0 = arith.constant 0 : i32
    %c0_i32_1 = arith.constant 0 : i32
    return %c0_i32, %c0_i32_0 : i32, i32
  }
  func.func @transform_5(%arg0: i32) -> (i32, i32) {
    %c0_i32 = arith.constant 0 : i32
    %c0_i32_0 = arith.constant 0 : i32
    %c0_i32_1 = arith.constant 0 : i32
    return %c0_i32, %c0_i32_0 : i32, i32
  }
  func.func @transform_6(%arg0: i32) -> (i32, i32) {
    %c0_i32 = arith.constant 0 : i32
    %c0_i32_0 = arith.constant 0 : i32
    %c0_i32_1 = arith.constant 0 : i32
    return %c0_i32, %c0_i32_0 : i32, i32
  }
  func.func @transform_7(%arg0: i32) -> (i32, i32) {
    %c0_i32 = arith.constant 0 : i32
    %c0_i32_0 = arith.constant 0 : i32
    %c0_i32_1 = arith.constant 0 : i32
    return %c0_i32, %c0_i32_0 : i32, i32
  }
  func.func @transform_8(%arg0: i32) -> (i32, i32) {
    %c0_i32 = arith.constant 0 : i32
    %c0_i32_0 = arith.constant 0 : i32
    %c0_i32_1 = arith.constant 0 : i32
    return %c0_i32, %c0_i32_0 : i32, i32
  }
  func.func @transform_9(%arg0: i32) -> (i32, i32) {
    %c0_i32 = arith.constant 0 : i32
    %c0_i32_0 = arith.constant 0 : i32
    return %arg0, %c0_i32 : i32, i32
  }
}

</mosaic_0001>

<bundles_post_ra>
// kernel: tpu_custom_call.1
= control target key start
LH: loop header
LB: loop body
LE: loop exit
PB: predicated region body
PF: predicated region fallthrough
CT: control target
= control target key end

     0   :  { %s625_s0 = inlined_call_operand.vmem [shape: f32[2,12], index: 0, kind: input, shape index: {}]   ;;  %s626_s1 = inlined_call_operand.vmem [shape: f32[2,4], index: 1, kind: input, shape index: {}]   ;;  %s627_s2 = inlined_call_operand.hbm [shape: f32[12,32], index: 2, kind: input, shape index: {}]   ;;  %s628_s3 = inlined_call_operand.vmem [shape: f32[4,32], index: 3, kind: input, shape index: {}]   ;;  %s629_s4 = inlined_call_operand.vmem [shape: f32[1,32], index: 4, kind: input, shape index: {}]   ;;  %s630_s5 = inlined_call_operand.vmem [shape: f32[32,32], index: 5, kind: input, shape index: {}]   ;;  %s631_s6 = inlined_call_operand.vmem [shape: f32[1,32], index: 6, kind: input, shape index: {}]   ;;  %s632_s7 = inlined_call_operand.vmem [shape: f32[32,1], index: 7, kind: input, shape index: {}]   ;;  %s633_s8 = inlined_call_operand.<no memory space> [shape: f32[1,1], index: 8, kind: input, shape index: {}]   ;;  %s634_s9 = inlined_call_operand.vmem [shape: f32[2,1], index: 9, kind: output, shape index: {}]  }
   0x1   :  { %v14_v0 = vstv %s633_s8 }
   0x2   :  { %15 = vst [vmem:[#allocation2] sm:$0x1] %v14_v0 }
   0x3   :  { %16 = vsyncpa [#allocation4], 0  ;;  %s516_s11 = smov [#allocation3]  }
   0x4   :  { %s26_s12 = sshll.u32 %s516_s11, 4  ;;  %s27_s12 = int_to_ptr.vmem [resolvable:$true] %s26_s12 }
   0x5   :  { %s502_s13 = scalar_lea.vmem %s27_s12, 256  ;;  %p507_p1 = scmp.lt.s32.totalorder %s27_s12, %s27_s12 }
   0x6   :  { %p503_p0 = scmp.ne.s32.totalorder %s27_s12, %s502_s13  ;;  %p508_p2 = scmp.lt.s32.totalorder %s502_s13, %s502_s13 }
   0x8   :  { %p509_p3 = por %p508_p2, %p507_p1 }
   0xa   :  { %p510_p4 = pnand %p509_p3, %p503_p0 }
   0xc   :  { %513 = shalt.err (!%p510_p4)
}
   0xd   :  { %s517_s14 = smov 128   ;;  %s518_s15 = smov 8  }
   0xe   :  { %32 = dma.hbm_to_vmem [thread:$0]  %s627_s2, 256, %s27_s12, [#allocation4], %s517_s14, %s517_s14, %s518_s15  }
   0xf   :  { %514 = dma.done.wait [#allocation4], 256  }
  0x10   :  { %515 = vsyncadd [#allocation4], 4294967040  ;;  %v519_v1 = vmov 0.0   ;;  %vm520_vm0 = vmmov 0   ;;  %vm57_vm1 = vcmask 1043456   ;;  %vm53_vm2 = vcmask 31744  }
  0x11   :  { %455 = vmatprep.subr.mxu0 %v519_v1  ;;  %460 = vmatprep.subr.mxu1 %v519_v1  ;;  %v52_v2 = vld [vmem:[%s628_s3] sm:$0xf]  ;;  %v50_v3 = vld [vmem:[#allocation3 + $0x8] sm:$0xf]  ;;  %vm131_vm3 = vcmask 97280   ;;  %v220_v7 = vld [vmem:[%s630_s5 + $0x18] sm:$0xff] }
  0x12   :  { %457 = vmatprep.mubr.msk.f32.mxu0 %vm520_vm0, %v519_v1  ;;  %464 = vmatprep.mubr.msk.f32.mxu1 %vm520_vm0, %v519_v1  ;;  %v51_v4 = vld [vmem:[%s626_s1] sm:$0xff]  ;;  %v219_v8 = vld [vmem:[%s630_s5 + $0x10] sm:$0xff]  ;;  %v218_v9 = vld [vmem:[%s630_s5 + $0x8] sm:$0xff]  ;;  %vm228_vm4 = vcmask 261120   ;;  %vm387_vm5 = vcmask 7168  }
  0x13   :  { %456 = vmatpush3.msk.msra.mxu0 %vm57_vm1, %v52_v2  ;;  %461 = vmatpush3.msk.msra.mxu1 %vm57_vm1, %v50_v3  ;;  %v49_v5 = vld [vmem:[#allocation3] sm:$0xff]  ;;  %v306_v11 = vld [vmem:[%s632_s7 + $0x18] sm:$0xff]  ;;  %v435_v15 = vld [vmem:[%s629_s4] ss:$0 sm:$0xff] }
  0x14   :  { %v48_v6 = vld [vmem:[%s625_s0] sm:$0xff]  ;;  %458 = vmatmul.mubr.msk.f32.vlgmr.msra.gmra.mxu0 %vm53_vm2, %v51_v4  ;;  %462 = vmatprep.subr.mxu1 %v519_v1  ;;  %v305_v20 = vld [vmem:[%s632_s7 + $0x10] sm:$0xff]  ;;  %v304_v21 = vld [vmem:[%s632_s7 + $0x8] sm:$0xff] }
  0x15   :  { %463 = vmatpush3.msra.mxu1 %v49_v5  ;;  %467 = vmatprep.subr.mxu0 %v519_v1  ;;  %v217_v10 = vld [vmem:[%s630_s5] sm:$0xff] }
  0x16   :  { %465 = vmatmul.mubr.msk.f32.vlgmr.msra.gmra.mxu1 %vm131_vm3, %v48_v6  ;;  %475 = vmatprep.mubr.msk.f32.mxu0 %vm520_vm0, %v519_v1  ;;  %v303_v22 = vld [vmem:[%s632_s7] sm:$0xff] }
  0x17   :  { %478 = vmatprep.subr.mxu1 %v519_v1  ;;  %486 = vmatprep.mubr.msk.f32.mxu1 %vm520_vm0, %v519_v1  ;;  %v436_v23 = vld [vmem:[%s631_s6] ss:$0 sm:$0xff] }
  0x18   :  { %468 = vmatpush3.msra.mxu0 %v220_v7  ;;  %479 = vmatpush3.msra.mxu1 %v306_v11  ;;  %v438_v28 = vld [vmem:[#allocation2] ss:$0 sm:$0xff] }
  0x19   :  { %469 = vmatprep.subr.mxu0 %v519_v1  ;;  %480 = vmatprep.subr.mxu1 %v519_v1 }
  0x1a   :  { %470 = vmatpush3.msra.mxu0 %v219_v8  ;;  %481 = vmatpush3.msra.mxu1 %v305_v20 }
  0x1b   :  { %471 = vmatprep.subr.mxu0 %v519_v1  ;;  %482 = vmatprep.subr.mxu1 %v519_v1 }
  0x1c   :  { %472 = vmatpush3.msra.mxu0 %v218_v9  ;;  %483 = vmatpush3.msra.mxu1 %v304_v21 }
  0x1d   :  { %473 = vmatprep.subr.mxu0 %v519_v1  ;;  %484 = vmatprep.subr.mxu1 %v519_v1 }
  0x1e   :  { %474 = vmatpush3.msra.mxu0 %v217_v10  ;;  %485 = vmatpush3.msra.mxu1 %v303_v22 }
  0xd4   :  { %v127_v12 = vpop.f32.mrf.mxu0 }
  0xd6   :  { %v459_v13 = vpop.f32.mrf.mxu0  ;;  %v204_v14 = vpop.f32.mrf.mxu1 }
  0xd7   :  { %v205_v16 = vadd.f32 %v204_v14, %v127_v12 }
  0xd8   :  { %v466_v17 = vpop.f32.mrf.mxu1 }
  0xd9   :  { %v215_v18 = vadd.f32 %v435_v15, %v205_v16 }
  0xdb   :  { %v216_v19 = vmax.f32 %v215_v18, 0.0 }
  0xdd   :  { %476 = vmatmul.mubr.msk.f32.vlgmr.msra.gmra.mxu0 %vm228_vm4, %v216_v19 }
 0x19d   :  { %v298_v24 = vpop.f32.mrf.mxu0 }
 0x19e   :  { %v299_v25 = vadd.f32 %v436_v23, %v298_v24 }
 0x19f   :  { %v477_v26 = vpop.f32.mrf.mxu0 }
 0x1a0   :  { %v302_v27 = vmax.f32 %v299_v25, 0.0 }
 0x1a2   :  { %487 = vmatmul.mubr.msk.f32.vlgmr.msra.gmra.mxu1 %vm228_vm4, %v302_v27 }
 0x262   :  { %v383_v29 = vpop.f32.mrf.mxu1 }
 0x263   :  { %v384_v30 = vadd.f32 %v438_v28, %v383_v29 }
 0x264   :  { %v488_v31 = vpop.f32.mrf.mxu1 }
 0x265   :  { %388 = vst.msk [vmem:[#allocation5] sm:$0xff] %vm387_vm5, %v384_v30 }
 0x26c   :  { %v407_v32 = vld [vmem:[#allocation5] sm:$0x3] }
 0x26d   :  { %408 = vst [vmem:[%s634_s9] sm:$0x3] %v407_v32 }
 0x26e   :  { %426 = vsyncpa [#allocation4], 1 }

</bundles_post_ra>
